<compile_context>
chip_gen: v7x
topology: tpu7x:2x2x1
jax: 0.10.0
libtpu: 0.0.40
codegen_flags: <defaults>
</compile_context>

<pallas_src>
import functools
import math

import jax
import jax.numpy as jnp
from jax import lax
from jax.experimental import pallas as pl
from jax.experimental.pallas import tpu as pltpu

SMOOTH = 1e-6
_LANE = 128


def _product_loss_kernel(pred_ref, gt_ref, out_ref, *,
                         tn, w, nchunk, cols, ragged):
    """Accumulate per-packed-row partials of p*p, g*g, g*p, |p-g| (p=tanh(pred))
    into out_ref of shape (4, rows, w).  Grid axis 0 is the reduction axis."""
    k = pl.program_id(0)
    rows = pred_ref.shape[0]

    @pl.when(k == 0)
    def _init():
        out_ref[...] = jnp.zeros_like(out_ref)

    lane = None
    if ragged:
        # Hoisted lane-index pattern; per chunk we only compare it against a
        # scalar limit (1 vcmp + 2 selects per input chunk).
        lane = lax.broadcasted_iota(jnp.int32, (rows, w), 1)

    def accumulate(start, pt2, yt2, ytpt, l1):
        # Native-dtype chunk in, f32 math (astype is a no-op for f32 inputs).
        x = pred_ref[:, pl.ds(start, w)].astype(jnp.float32)
        g = gt_ref[:, pl.ds(start, w)].astype(jnp.float32)
        if ragged:
            limit = cols - k * tn - start      # valid lane count in this chunk
            valid = lane < limit
            x = jnp.where(valid, x, 0.0)       # tanh(0) = 0: exact
            g = jnp.where(valid, g, 0.0)
        p = jnp.tanh(x)
        return (pt2 + p * p, yt2 + g * g, ytpt + g * p, l1 + jnp.abs(p - g))

    zero = jnp.zeros((rows, w), jnp.float32)
    if nchunk == 1:
        pt2, yt2, ytpt, l1 = accumulate(0, zero, zero, zero, zero)
    else:
        def body(c, carry):
            start = pl.multiple_of(c * w, _LANE)   # lane-tile-aligned slice
            return accumulate(start, *carry)
        pt2, yt2, ytpt, l1 = lax.fori_loop(0, nchunk, body,
                                           (zero, zero, zero, zero), unroll=2)

    # One fused, lane-dense accumulator block; 4 small RMW stores per step.
    out_ref[0] += pt2
    out_ref[1] += yt2
    out_ref[2] += ytpt
    out_ref[3] += l1


def product_loss(pred, gt, *, tile_elems=1024 * 1024, acc_width=512,
                 vmem_limit_bytes=32 * 1024 * 1024):
    """pred, gt: (B, 1, H, W) NCHW single-channel arrays, any float dtype.
    Matches PyTorch ProductLoss.forward."""
    assert pred.shape[1] == 1 and gt.shape[1] == 1, "single-channel inputs"
    assert pred.shape == gt.shape
    b = pred.shape[0]
    n = math.prod(pred.shape[1:])

    # Sublane packing: (B, N) -> (B*g, N/g) is a pure metadata reshape (rows
    # stay contiguous); g fills the 8 sublanes when B < 8 and divides N.
    need = 8 // math.gcd(b, 8)
    g = need if n % need == 0 else 1
    rows, cols = b * g, n // g
    pred_f = pred.reshape(rows, cols)
    gt_f = gt.reshape(rows, cols)

    # --- tiling -------------------------------------------------------------
    #  w : accumulator lane width (kept small enough that the four f32 carries
    #      stay in vregs inside the chunk loop: rows*w <= 8192 elems).
    #  tn: lane width of one grid-step tile (a multiple of w); the single grid
    #      axis is the reduction axis.
    if cols < _LANE or rows * cols <= min(8192, tile_elems):
        w = tn = cols                      # tiny input: one tile, one chunk
        kt = nchunk = 1
        ragged = False
    else:
        w = min(acc_width, max(_LANE, (8192 // rows) // _LANE * _LANE))
        w = min(w, (cols // _LANE) * _LANE)
        tn_max = max(w, (tile_elems // rows) // w * w)
        tn = min(tn_max, (cols // w) * w)  # tn <= cols, multiple of w (and 128)
        kt = pl.cdiv(cols, tn)
        nchunk = tn // w
        ragged = (cols % tn) != 0          # last tile masked in-kernel, no pad

    kernel = functools.partial(_product_loss_kernel, tn=tn, w=w,
                               nchunk=nchunk, cols=cols, ragged=ragged)

    parts = pl.pallas_call(
        kernel,
        out_shape=jax.ShapeDtypeStruct((4, rows, w), jnp.float32),
        grid=(kt,),
        in_specs=[
            pl.BlockSpec((rows, tn), lambda k: (0, k)),
            pl.BlockSpec((rows, tn), lambda k: (0, k)),
        ],
        # Single fused, lane-dense output block, VMEM-resident across the whole
        # reduction axis (constant index_map), written back to HBM once.
        out_specs=pl.BlockSpec((4, rows, w), lambda k: (0, 0, 0)),
        compiler_params=pltpu.CompilerParams(
            dimension_semantics=("arbitrary",),
            vmem_limit_bytes=vmem_limit_bytes,
        ),
        cost_estimate=pl.CostEstimate(
            flops=10 * rows * cols,
            transcendentals=rows * cols,
            bytes_accessed=rows * cols * (pred_f.dtype.itemsize
                                          + gt_f.dtype.itemsize),
        ),
    )(pred_f, gt_f)

    # O(b*w) finalize in plain JAX: collapse lanes and the packing factor, then
    # the nonlinear fraction and the means with the ORIGINAL b and n.
    sums = parts.sum(axis=-1).reshape(4, b, g).sum(axis=-1)     # (4, b)
    pt2, yt2, ytpt, l1 = sums[0], sums[1], sums[2], sums[3]
    frac = (ytpt + SMOOTH) / (ytpt + pt2 + yt2 + SMOOTH)
    return -jnp.mean(frac) + jnp.sum(l1) / jnp.float32(b * n)


def _product_loss_ref(pred, gt):
    # Pure-JAX reference mirroring the PyTorch forward exactly.
    b = pred.shape[0]
    p = jnp.tanh(pred.reshape(b, -1).astype(jnp.float32))
    g = gt.reshape(b, -1).astype(jnp.float32)
    pt2 = jnp.sum(p * p, axis=-1)
    yt2 = jnp.sum(g * g, axis=-1)
    ytpt = jnp.sum(g * p, axis=-1)
    frac = (ytpt + SMOOTH) / (ytpt + pt2 + yt2 + SMOOTH)
    return -jnp.mean(frac) + jnp.mean(jnp.abs(p - g))


if __name__ == "__main__":
    key = jax.random.PRNGKey(0)
    ks = jax.random.split(key, 12)

    def check(name, pred, gt, **kw):
        loss = product_loss(pred, gt, **kw)
        jax.block_until_ready(loss)
        ref = _product_loss_ref(pred, gt)
        assert jnp.isfinite(loss), (name, loss)
        assert jnp.allclose(loss, ref, atol=1e-5, rtol=1e-5), (name, loss, ref)

    # A: B=2, N=256 -> g=4, rows=8, cols=64: sublane-packed single tile.
    p = jax.random.normal(ks[0], (2, 1, 16, 16), jnp.float32)
    t = (jax.random.uniform(ks[1], (2, 1, 16, 16)) > 0.5).astype(jnp.float32)
    check("A", p, t)

    # B: non-power-of-two flattened size (N=480 -> cols=120).
    p = jax.random.normal(ks[2], (2, 1, 20, 24), jnp.float32)
    t = (jax.random.uniform(ks[3], (2, 1, 20, 24)) > 0.5).astype(jnp.float32)
    check("B", p, t)

    # C: N=195 not divisible by the packing factor -> g=1 fallback (rows=2).
    p = jax.random.normal(ks[4], (2, 1, 15, 13), jnp.float32)
    t = (jax.random.uniform(ks[5], (2, 1, 15, 13)) > 0.5).astype(jnp.float32)
    check("C", p, t)

    # D: larger image -> chunked path (fori_loop over lane chunks, nchunk=6).
    p = jax.random.normal(ks[6], (2, 1, 128, 96), jnp.float32)
    t = (jax.random.uniform(ks[7], (2, 1, 128, 96)) > 0.5).astype(jnp.float32)
    check("D", p, t)

    # E: small tile override -> multi-step reduction grid (kt=2) + ragged last
    #    tile exercising the in-kernel mask (no padding anywhere).
    p = jax.random.normal(ks[8], (2, 1, 128, 100), jnp.float32)
    t = (jax.random.uniform(ks[9], (2, 1, 128, 100)) > 0.5).astype(jnp.float32)
    check("E", p, t, tile_elems=16384)

    # F: bf16 inputs streamed in native dtype, upcast in-kernel.
    p = jax.random.normal(ks[10], (2, 1, 16, 16), jnp.bfloat16)
    t = (jax.random.uniform(ks[11], (2, 1, 16, 16)) > 0.5).astype(jnp.bfloat16)
    check("F", p, t)

    print("KERNEL_OK")
</pallas_src>

<mosaic_0001>
module attributes {stable_mosaic.version = 11 : i64} {
  func.func @_product_loss_kernel(%arg0: i32, %arg1: memref<8x64xf32, #tpu.memory_space<vmem>>, %arg2: memref<8x64xf32, #tpu.memory_space<vmem>>, %arg3: memref<4x8x64xf32, #tpu.memory_space<vmem>>) attributes {dimension_semantics = [#tpu.dimension_semantics<arbitrary>], iteration_bounds = array<i64: 1>, scalar_prefetch = 0 : i64, scratch_operands = 0 : i64, tpu.core_type = #tpu.core_type<tc>, window_params = [{transform_indices = @transform_0, window_bounds = array<i64: 8, 64>}, {transform_indices = @transform_1, window_bounds = array<i64: 8, 64>}, {pipeline_mode = #tpu.pipeline_mode<synchronous>, transform_indices = @transform_2, window_bounds = array<i64: 4, 8, 64>}]} {
    %c0_i32 = arith.constant 0 : i32
    %0 = arith.cmpi eq, %arg0, %c0_i32 : i32
    %1 = arith.extui %0 : i1 to i32
    %c0_i32_0 = arith.constant 0 : i32
    %2 = arith.cmpi ne, %1, %c0_i32_0 : i32
    scf.if %2 {
      %cst_25 = arith.constant 0.000000e+00 : f32
      %40 = vector.broadcast %cst_25 : f32 to vector<4x8x64xf32>
      %c0_26 = arith.constant 0 : index
      %c0_27 = arith.constant 0 : index
      %c0_28 = arith.constant 0 : index
      %41 = vector.load %arg3[%c0_26, %c0_27, %c0_28] : memref<4x8x64xf32, #tpu.memory_space<vmem>>, vector<4x8x64xf32>
      tpu.vector_store %arg3[%c0_26, %c0_27, %c0_28], %40 {strides = array<i32>} : memref<4x8x64xf32, #tpu.memory_space<vmem>>, vector<4x8x64xf32>,
    } else {
    }
    %cst = arith.constant 0.000000e+00 : f32
    %3 = vector.broadcast %cst : f32 to vector<8x64xf32>
    %c0 = arith.constant 0 : index
    %c0_1 = arith.constant 0 : index
    %4 = vector.load %arg1[%c0, %c0_1] : memref<8x64xf32, #tpu.memory_space<vmem>>, vector<8x64xf32>
    %c0_2 = arith.constant 0 : index
    %c0_3 = arith.constant 0 : index
    %5 = vector.load %arg2[%c0_2, %c0_3] : memref<8x64xf32, #tpu.memory_space<vmem>>, vector<8x64xf32>
    %6 = math.tanh %4 : vector<8x64xf32>
    %7 = arith.mulf %6, %6 : vector<8x64xf32>
    %8 = arith.addf %3, %7 : vector<8x64xf32>
    %9 = arith.mulf %5, %5 : vector<8x64xf32>
    %10 = arith.addf %3, %9 : vector<8x64xf32>
    %11 = arith.mulf %5, %6 : vector<8x64xf32>
    %12 = arith.addf %3, %11 : vector<8x64xf32>
    %13 = arith.subf %6, %5 : vector<8x64xf32>
    %14 = math.absf %13 : vector<8x64xf32>
    %15 = arith.addf %3, %14 : vector<8x64xf32>
    %c0_4 = arith.constant 0 : index
    %c0_5 = arith.constant 0 : index
    %c0_6 = arith.constant 0 : index
    %16 = vector.load %arg3[%c0_4, %c0_5, %c0_6] : memref<4x8x64xf32, #tpu.memory_space<vmem>>, vector<1x8x64xf32>
    %17 = vector.shape_cast %16 : vector<1x8x64xf32> to vector<8x64xf32>
    %18 = arith.addf %17, %8 : vector<8x64xf32>
    %c0_7 = arith.constant 0 : index
    %c0_8 = arith.constant 0 : index
    %c0_9 = arith.constant 0 : index
    %19 = vector.load %arg3[%c0_7, %c0_8, %c0_9] : memref<4x8x64xf32, #tpu.memory_space<vmem>>, vector<1x8x64xf32>
    %20 = vector.shape_cast %19 : vector<1x8x64xf32> to vector<8x64xf32>
    %21 = vector.shape_cast %18 : vector<8x64xf32> to vector<1x8x64xf32>
    tpu.vector_store %arg3[%c0_7, %c0_8, %c0_9], %21 {strides = array<i32>} : memref<4x8x64xf32, #tpu.memory_space<vmem>>, vector<1x8x64xf32>,
    %c1 = arith.constant 1 : index
    %c0_10 = arith.constant 0 : index
    %c0_11 = arith.constant 0 : index
    %22 = vector.load %arg3[%c1, %c0_10, %c0_11] : memref<4x8x64xf32, #tpu.memory_space<vmem>>, vector<1x8x64xf32>
    %23 = vector.shape_cast %22 : vector<1x8x64xf32> to vector<8x64xf32>
    %24 = arith.addf %23, %10 : vector<8x64xf32>
    %c1_12 = arith.constant 1 : index
    %c0_13 = arith.constant 0 : index
    %c0_14 = arith.constant 0 : index
    %25 = vector.load %arg3[%c1_12, %c0_13, %c0_14] : memref<4x8x64xf32, #tpu.memory_space<vmem>>, vector<1x8x64xf32>
    %26 = vector.shape_cast %25 : vector<1x8x64xf32> to vector<8x64xf32>
    %27 = vector.shape_cast %24 : vector<8x64xf32> to vector<1x8x64xf32>
    tpu.vector_store %arg3[%c1_12, %c0_13, %c0_14], %27 {strides = array<i32>} : memref<4x8x64xf32, #tpu.memory_space<vmem>>, vector<1x8x64xf32>,
    %c2 = arith.constant 2 : index
    %c0_15 = arith.constant 0 : index
    %c0_16 = arith.constant 0 : index
    %28 = vector.load %arg3[%c2, %c0_15, %c0_16] : memref<4x8x64xf32, #tpu.memory_space<vmem>>, vector<1x8x64xf32>
    %29 = vector.shape_cast %28 : vector<1x8x64xf32> to vector<8x64xf32>
    %30 = arith.addf %29, %12 : vector<8x64xf32>
    %c2_17 = arith.constant 2 : index
    %c0_18 = arith.constant 0 : index
    %c0_19 = arith.constant 0 : index
    %31 = vector.load %arg3[%c2_17, %c0_18, %c0_19] : memref<4x8x64xf32, #tpu.memory_space<vmem>>, vector<1x8x64xf32>
    %32 = vector.shape_cast %31 : vector<1x8x64xf32> to vector<8x64xf32>
    %33 = vector.shape_cast %30 : vector<8x64xf32> to vector<1x8x64xf32>
    tpu.vector_store %arg3[%c2_17, %c0_18, %c0_19], %33 {strides = array<i32>} : memref<4x8x64xf32, #tpu.memory_space<vmem>>, vector<1x8x64xf32>,
    %c3 = arith.constant 3 : index
    %c0_20 = arith.constant 0 : index
    %c0_21 = arith.constant 0 : index
    %34 = vector.load %arg3[%c3, %c0_20, %c0_21] : memref<4x8x64xf32, #tpu.memory_space<vmem>>, vector<1x8x64xf32>
    %35 = vector.shape_cast %34 : vector<1x8x64xf32> to vector<8x64xf32>
    %36 = arith.addf %35, %15 : vector<8x64xf32>
    %c3_22 = arith.constant 3 : index
    %c0_23 = arith.constant 0 : index
    %c0_24 = arith.constant 0 : index
    %37 = vector.load %arg3[%c3_22, %c0_23, %c0_24] : memref<4x8x64xf32, #tpu.memory_space<vmem>>, vector<1x8x64xf32>
    %38 = vector.shape_cast %37 : vector<1x8x64xf32> to vector<8x64xf32>
    %39 = vector.shape_cast %36 : vector<8x64xf32> to vector<1x8x64xf32>
    tpu.vector_store %arg3[%c3_22, %c0_23, %c0_24], %39 {strides = array<i32>} : memref<4x8x64xf32, #tpu.memory_space<vmem>>, vector<1x8x64xf32>,
    return
  }
  func.func @transform_0(%arg0: i32) -> (i32, i32) {
    %c0_i32 = arith.constant 0 : i32
    %c0_i32_0 = arith.constant 0 : i32
    return %c0_i32, %arg0 : i32, i32
  }
  func.func @transform_1(%arg0: i32) -> (i32, i32) {
    %c0_i32 = arith.constant 0 : i32
    %c0_i32_0 = arith.constant 0 : i32
    return %c0_i32, %arg0 : i32, i32
  }
  func.func @transform_2(%arg0: i32) -> (i32, i32, i32) {
    %c0_i32 = arith.constant 0 : i32
    %c0_i32_0 = arith.constant 0 : i32
    %c0_i32_1 = arith.constant 0 : i32
    %c0_i32_2 = arith.constant 0 : i32
    return %c0_i32, %c0_i32_0, %c0_i32_1 : i32, i32, i32
  }
}

</mosaic_0001>

<bundles_post_ra>
// kernel: tpu_custom_call.1
= control target key start
LH: loop header
LB: loop body
LE: loop exit
PB: predicated region body
PF: predicated region fallthrough
CT: control target
= control target key end

     0   :  { %7 = vsyncpa [#allocation3], 0  ;;  %s236_s0 = inlined_call_operand.hbm [shape: f32[8,64], index: 0, kind: input, shape index: {}]   ;;  %s237_s1 = inlined_call_operand.hbm [shape: f32[8,64], index: 1, kind: input, shape index: {}]   ;;  %s238_s2 = inlined_call_operand.hbm [shape: f32[4,8,64], index: 2, kind: output, shape index: {}]  }
   0x1   :  { %8 = vsyncpa [#allocation6], 0 }
   0x2   :  { %9 = vsyncpa [#allocation4], 0  ;;  %s171_s9 = smov [#allocation2]   ;;  %s172_s11 = smov [#allocation5]  }
   0x3   :  { %s16_s10 = sshll.u32 %s171_s9, 4  ;;  %s26_s12 = sshll.u32 %s172_s11, 4  ;;  %s17_s10 = int_to_ptr.vmem [resolvable:$true] %s16_s10  ;;  %s27_s12 = int_to_ptr.vmem [resolvable:$true] %s26_s12 }
   0x4   :  { %s99_s15 = scalar_lea.hbm %s236_s0, 128 }
   0x5   :  { %p100_p0 = scmp.ne.s32.totalorder %s236_s0, %s99_s15  ;;  %p103_p1 = scmp.lt.u32.totalorder %s99_s15, %s236_s0 }
   0x7   :  { %p105_p2 = pnand %p103_p1, %p100_p0 }
   0x9   :  { %108 = shalt.err (!%p105_p2)
}
   0xa   :  { %s109_s20 = scalar_lea.vmem %s17_s10, 128  ;;  %p114_p4 = scmp.lt.s32.totalorder %s17_s10, %s17_s10 }
   0xb   :  { %p110_p3 = scmp.ne.s32.totalorder %s17_s10, %s109_s20  ;;  %p115_p5 = scmp.lt.s32.totalorder %s109_s20, %s109_s20 }
   0xd   :  { %p116_p6 = por %p115_p5, %p114_p4 }
   0xf   :  { %p117_p7 = pnand %p116_p6, %p110_p3 }
  0x11   :  { %120 = shalt.err (!%p117_p7)
}
  0x12   :  { %19 = dma.hbm_to_vmem [thread:$0]  %s236_s0, 128, %s17_s10, [#allocation3]  }
  0x13   :  { %s121_s25 = scalar_lea.hbm %s237_s1, 128 }
  0x14   :  { %p122_p8 = scmp.ne.s32.totalorder %s237_s1, %s121_s25  ;;  %p125_p9 = scmp.lt.u32.totalorder %s121_s25, %s237_s1 }
  0x16   :  { %p127_p10 = pnand %p125_p9, %p122_p8 }
  0x18   :  { %130 = shalt.err (!%p127_p10)
}
  0x19   :  { %s131_s30 = scalar_lea.vmem %s27_s12, 128  ;;  %p136_p12 = scmp.lt.s32.totalorder %s27_s12, %s27_s12 }
  0x1a   :  { %p132_p11 = scmp.ne.s32.totalorder %s27_s12, %s131_s30  ;;  %p137_p13 = scmp.lt.s32.totalorder %s131_s30, %s131_s30 }
  0x1c   :  { %p138_p0 = por %p137_p13, %p136_p12 }
  0x1e   :  { %p139_p1 = pnand %p138_p0, %p132_p11 }
  0x20   :  { %142 = shalt.err (!%p139_p1)
}
  0x21   :  { %29 = dma.hbm_to_vmem [thread:$0]  %s237_s1, 128, %s27_s12, [#allocation6]  }
  0x22   :  { %165 = dma.done.wait [#allocation3], 128  }
  0x23   :  { %166 = vsyncadd [#allocation3], 4294967168 }
  0x24   :  { %167 = dma.done.wait [#allocation6], 128  }
  0x25   :  { %168 = vsyncadd [#allocation6], 4294967168  ;;  %vm40_vm0 = vcmask 523264   ;;  %v173_v0 = vmov 0.0   ;;  %v45_v1 = vld [vmem:[#allocation2] sm:$0xff]  ;;  %v46_v2 = vld [vmem:[#allocation5] sm:$0xff] }
  0x26   :  { %41 = vst.msk [vmem:[#allocation7] sm:$0xff] %vm40_vm0, %v173_v0  ;;  %42 = vst.msk [vmem:[#allocation7 + $0x8] sm:$0xff] %vm40_vm0, %v173_v0  ;;  %97 = vtanh.f32 %v45_v1  ;;  %v50_v3 = vmul.f32 %v46_v2, %v46_v2  ;;  %s174_s1 = smov [#allocation7]  }
  0x27   :  { %43 = vst.msk [vmem:[#allocation7 + $0x10] sm:$0xff] %vm40_vm0, %v173_v0  ;;  %44 = vst.msk [vmem:[#allocation7 + $0x18] sm:$0xff] %vm40_vm0, %v173_v0  ;;  %s78_s4 = sshll.u32 %s174_s1, 4  ;;  %s79_s4 = int_to_ptr.vmem [resolvable:$true] %s78_s4 }
  0x28   :  { %s143_s5 = scalar_lea.vmem %s79_s4, 512  ;;  %p148_p3 = scmp.lt.s32.totalorder %s79_s4, %s79_s4 }
  0x29   :  { %p144_p2 = scmp.ne.s32.totalorder %s79_s4, %s143_s5  ;;  %p149_p4 = scmp.lt.s32.totalorder %s143_s5, %s143_s5 }
  0x2b   :  { %p150_p5 = por %p149_p4, %p148_p3 }
  0x2d   :  { %v62_v4 = vld [vmem:[#allocation7 + $0x8] sm:$0xff]  ;;  %v57_v7 = vld [vmem:[#allocation7] sm:$0xff]  ;;  %p151_p6 = pnand %p150_p5, %p144_p2 }
  0x2e   :  { %v63_v5 = vadd.f32 %v62_v4, %v50_v3  ;;  %v66_v8 = vld [vmem:[#allocation7 + $0x10] sm:$0xff]  ;;  %v70_v12 = vld [vmem:[#allocation7 + $0x18] sm:$0xff] }
  0x30   :  { %64 = vst.msk [vmem:[#allocation7 + $0x8] sm:$0xff] %vm40_vm0, %v63_v5  ;;  %v98_v6 = vpop.eup %97 }
  0x31   :  { %v48_v9 = vmul.f32 %v98_v6, %v98_v6  ;;  %v52_v10 = vmul.f32 %v98_v6, %v46_v2  ;;  %v54_v11 = vsub.f32 %v98_v6, %v46_v2 }
  0x33   :  { %v58_v13 = vadd.f32 %v57_v7, %v48_v9  ;;  %v67_v14 = vadd.f32 %v66_v8, %v52_v10  ;;  %v55_v15 = vand.u32 2147483647, %v54_v11 }
  0x35   :  { %60 = vst.msk [vmem:[#allocation7] sm:$0xff] %vm40_vm0, %v58_v13  ;;  %68 = vst.msk [vmem:[#allocation7 + $0x10] sm:$0xff] %vm40_vm0, %v67_v14  ;;  %v71_v16 = vadd.f32 %v70_v12, %v55_v15 }
  0x37   :  { %72 = vst.msk [vmem:[#allocation7 + $0x18] sm:$0xff] %vm40_vm0, %v71_v16 }
  0x38   :  { %154 = shalt.err (!%p151_p6)
}
  0x39   :  { %s155_s8 = scalar_lea.hbm %s238_s2, 512 }
  0x3a   :  { %p156_p7 = scmp.ne.s32.totalorder %s238_s2, %s155_s8  ;;  %p159_p8 = scmp.lt.u32.totalorder %s155_s8, %s238_s2 }
  0x3c   :  { %p161_p9 = pnand %p159_p8, %p156_p7 }
  0x3e   :  { %164 = shalt.err (!%p161_p9)
}
  0x3f   :  { %s175_s13 = smov 128   ;;  %s176_s14 = smov 8  }
  0x40   :  { %84 = dma.vmem_to_hbm [thread:$0]  %s79_s4, 512, %s238_s2, [#allocation4], %s175_s13, %s175_s13, %s176_s14  }
  0x41   :  { %169 = dma.done.wait [#allocation4], 512  }
  0x42   :  { %170 = vsyncadd [#allocation4], 4294966784 }
  0x43   :  { %88 = vsyncpa [#allocation3], 1 }
  0x44   :  { %89 = vsyncpa [#allocation6], 1 }
  0x45   :  { %90 = vsyncpa [#allocation4], 1 }

</bundles_post_ra>
